<compile_context>
chip_gen: v6e
topology: v6e:2x2x1
jax: 0.10.0
libtpu: 0.0.40
codegen_flags: <defaults>
</compile_context>

<pallas_src>
import functools
import math

import numpy as np
import jax
import jax.numpy as jnp
from jax.experimental import pallas as pl
from jax.experimental.pallas import tpu as pltpu


def _round_up(x, m):
    return (x + m - 1) // m * m


@functools.lru_cache(maxsize=1)
def _vmem_budget_bytes():
    try:
        info = pltpu.get_tpu_info()
        return int(getattr(info, "vmem_capacity_bytes", 64 * 2**20))
    except Exception:  # pragma: no cover - conservative fallback
        return 64 * 2**20


def _tile_caps():
    # VMEM-aware tile caps: roomier tiles on 128 MiB parts (v5e/v6e), tighter on
    # v7x (64 MiB physical / 2 TensorCores).
    if _vmem_budget_bytes() >= 96 * 2**20:
        return 256, 1024, 512          # tm, tk, tn caps
    return 256, 512, 512


def _plan(dim, cap):
    """Return (tile, padded_dim): full-dim block when small, cap-sized otherwise."""
    if dim <= cap:
        return dim, dim
    return cap, _round_up(dim, cap)


def _mosaic_params(dimension_semantics, working_bytes):
    kwargs = dict(dimension_semantics=dimension_semantics)
    # Only raise the scoped-VMEM limit when the double-buffered working set would
    # not fit the conservative default; never above half the physical budget.
    if working_bytes > 16 * 2**20:
        kwargs["vmem_limit_bytes"] = int(
            min(max(2 * working_bytes, 32 * 2**20), _vmem_budget_bytes() // 2))
    return pltpu.CompilerParams(**kwargs)


# ================= Pallas kernel 1: matmul + bias (f32 accum) ===============
def _matmul_bias_kernel(a_ref, b_ref, bias_ref, o_ref):
    # grid = (M_blocks, N_blocks, K_blocks); reduction axis innermost.
    k = pl.program_id(2)

    @pl.when(k == 0)
    def _():
        o_ref[...] = jnp.broadcast_to(bias_ref[...], o_ref.shape)

    o_ref[...] += jnp.dot(a_ref[...], b_ref[...],
                          preferred_element_type=jnp.float32)


def pallas_matmul_bias(a, w, bias):
    """y = a @ w + bias.  a:(M,K), w:(K,N), bias:(N,).  bf16 MXU in, f32 out."""
    M, K = a.shape
    _, N = w.shape
    tm_cap, tk_cap, tn_cap = _tile_caps()
    tm, Mp = _plan(M, tm_cap)
    tk, Kp = _plan(K, tk_cap)
    tn, Np = _plan(N, tn_cap)

    a = a.astype(jnp.bfloat16)
    w = w.astype(jnp.bfloat16)
    bias2 = bias.astype(jnp.float32).reshape(1, N)
    if (Mp, Kp) != (M, K):
        a = jnp.pad(a, ((0, Mp - M), (0, Kp - K)))
    if (Kp, Np) != (K, N):
        w = jnp.pad(w, ((0, Kp - K), (0, Np - N)))
    if Np != N:
        bias2 = jnp.pad(bias2, ((0, 0), (0, Np - N)))

    working = 2 * (tm * tk * 2 + tk * tn * 2 + tn * 4 + tm * tn * 4)
    out = pl.pallas_call(
        _matmul_bias_kernel,
        out_shape=jax.ShapeDtypeStruct((Mp, Np), jnp.float32),
        grid_spec=pltpu.PrefetchScalarGridSpec(
            num_scalar_prefetch=0,
            grid=(Mp // tm, Np // tn, Kp // tk),
            in_specs=[pl.BlockSpec((tm, tk), lambda i, j, k: (i, k)),
                      pl.BlockSpec((tk, tn), lambda i, j, k: (k, j)),
                      pl.BlockSpec((1, tn), lambda i, j, k: (0, j))],
            out_specs=pl.BlockSpec((tm, tn), lambda i, j, k: (i, j))),
        compiler_params=_mosaic_params(("parallel", "parallel", "arbitrary"),
                                       working),
    )(a, w, bias2)
    if (Mp, Np) != (M, N):
        out = out[:M, :N]
    return out


# ====== Pallas kernel 2: box attention + residual-add + LayerNorm0 ==========
def _box_attn_ln_kernel(qkv_ref, wg_ref, mask_ref, res_ref, g_ref, b_ref, o_ref,
                        *, d_k, eps):
    # qkv: (Op, 3*d_k) bf16 ; wg: (Op, Op) f32 ; mask: (1, Op) f32
    # res: (Op, d_k) f32 ; g/b: (1, d_k) f32 ; o: (Op, d_k) f32
    qkv = qkv_ref[...]
    q = qkv[:, :d_k]                 # scale already folded into the q projection
    k = qkv[:, d_k:2 * d_k]
    v = qkv[:, 2 * d_k:]

    s = jax.lax.dot_general(q, k, (((1,), (1,)), ((), ())),
                            preferred_element_type=jnp.float32)      # (Op, Op)
    # masked_fill(mask == 0, -1e9), mask broadcast from (1, Op)
    s = jnp.where(mask_ref[...] == 0.0, jnp.float32(-1e9), s)
    # log(clamp(relu(w_g), min=1e-6)) == log(max(w_g, 1e-6))
    s = s + jnp.log(jnp.maximum(wg_ref[...], 1e-6))

    m = jnp.max(s, axis=-1, keepdims=True)
    p = jnp.exp(s - m)
    p = p * pl.reciprocal(jnp.sum(p, axis=-1, keepdims=True), approx=True)
    x = jnp.dot(p.astype(v.dtype), v, preferred_element_type=jnp.float32)

    # fused residual add + LayerNorm0 (f32)
    y = x + res_ref[...]
    mu = jnp.mean(y, axis=-1, keepdims=True)
    d = y - mu
    var = jnp.mean(d * d, axis=-1, keepdims=True)
    o_ref[...] = d * jax.lax.rsqrt(var + eps) * g_ref[...] + b_ref[...]


def pallas_box_attention_ln(qkv, wg, mask, residual, gamma, beta, *, d_k, eps=1e-5):
    """LayerNorm0( box_attention(q, k, v, wg, mask) + residual ).

    qkv: (B, O, 3*d_k) packed projections (q already scaled); wg: (B, O, O) raw
    geometry logits; mask: (B, O) or None; residual: (B, O, d_k).
    """
    B, O, _ = qkv.shape
    Op = max(_round_up(O, 8), 8)

    if mask is None:
        mask3 = jnp.ones((B, 1, O), jnp.float32)
    else:
        mask3 = mask.astype(jnp.float32).reshape(B, 1, O)
    residual = residual.astype(jnp.float32)
    wg = wg.astype(jnp.float32)
    qkv = qkv.astype(jnp.bfloat16)

    if Op != O:                       # ragged trailing edge only
        po = (0, Op - O)
        qkv = jnp.pad(qkv, ((0, 0), po, (0, 0)))
        wg = jnp.pad(wg, ((0, 0), po, po))            # zeros -> log(1e-6) finite
        mask3 = jnp.pad(mask3, ((0, 0), (0, 0), po))  # padded keys stay masked out
        residual = jnp.pad(residual, ((0, 0), po, (0, 0)))

    g2 = gamma.astype(jnp.float32).reshape(1, d_k)
    b2 = beta.astype(jnp.float32).reshape(1, d_k)

    working = 2 * (Op * 3 * d_k * 2 + Op * Op * 4 + Op * 4
                   + 2 * Op * d_k * 4 + 2 * d_k * 4)
    out = pl.pallas_call(
        functools.partial(_box_attn_ln_kernel, d_k=d_k, eps=eps),
        out_shape=jax.ShapeDtypeStruct((B, Op, d_k), jnp.float32),
        grid_spec=pltpu.PrefetchScalarGridSpec(
            num_scalar_prefetch=0,
            grid=(B,),   # per-batch blocks: bounded VMEM, shards across TCs
            in_specs=[pl.BlockSpec((None, Op, 3 * d_k), lambda bb: (bb, 0, 0)),
                      pl.BlockSpec((None, Op, Op), lambda bb: (bb, 0, 0)),
                      pl.BlockSpec((None, 1, Op), lambda bb: (bb, 0, 0)),
                      pl.BlockSpec((None, Op, d_k), lambda bb: (bb, 0, 0)),
                      pl.BlockSpec((1, d_k), lambda bb: (0, 0)),
                      pl.BlockSpec((1, d_k), lambda bb: (0, 0))],
            out_specs=pl.BlockSpec((None, Op, d_k), lambda bb: (bb, 0, 0))),
        compiler_params=_mosaic_params(("parallel",), working),
    )(qkv, wg, mask3, residual, g2, b2)
    if Op != O:
        out = out[:, :O, :]
    return out


# ====== Pallas kernel 3: linear + bias + residual-add + LayerNorm ===========
def _matmul_bias_add_ln_kernel(a_ref, b_ref, bias_ref, res_ref, g_ref, beta_ref,
                               o_ref, *, eps):
    k = pl.program_id(2)

    @pl.when(k == 0)
    def _():
        o_ref[...] = jnp.broadcast_to(bias_ref[...], o_ref.shape)

    o_ref[...] += jnp.dot(a_ref[...], b_ref[...],
                          preferred_element_type=jnp.float32)

    @pl.when(k == pl.num_programs(2) - 1)
    def _():
        y = o_ref[...] + res_ref[...]
        mu = jnp.mean(y, axis=-1, keepdims=True)
        d = y - mu
        var = jnp.mean(d * d, axis=-1, keepdims=True)
        o_ref[...] = d * jax.lax.rsqrt(var + eps) * g_ref[...] + beta_ref[...]


def pallas_linear_add_ln(a, w, bias, residual, gamma, beta, eps=1e-5):
    """LayerNorm(a @ w + bias + residual) with the epilogue fused on the last K step."""
    M, K = a.shape
    _, N = w.shape
    tm_cap, tk_cap, _ = _tile_caps()
    tm, Mp = _plan(M, tm_cap)
    tk, Kp = _plan(K, tk_cap)
    tn = N   # LayerNorm needs the full feature dim resident in one tile

    a = a.astype(jnp.bfloat16)
    w = w.astype(jnp.bfloat16)
    bias2 = bias.astype(jnp.float32).reshape(1, N)
    res = residual.astype(jnp.float32)
    g2 = gamma.astype(jnp.float32).reshape(1, N)
    b2 = beta.astype(jnp.float32).reshape(1, N)
    if (Mp, Kp) != (M, K):
        a = jnp.pad(a, ((0, Mp - M), (0, Kp - K)))
    if Kp != K:
        w = jnp.pad(w, ((0, Kp - K), (0, 0)))
    if Mp != M:
        res = jnp.pad(res, ((0, Mp - M), (0, 0)))

    working = 2 * (tm * tk * 2 + tk * tn * 2 + 3 * tn * 4 + 2 * tm * tn * 4)
    out = pl.pallas_call(
        functools.partial(_matmul_bias_add_ln_kernel, eps=eps),
        out_shape=jax.ShapeDtypeStruct((Mp, N), jnp.float32),
        grid_spec=pltpu.PrefetchScalarGridSpec(
            num_scalar_prefetch=0,
            grid=(Mp // tm, 1, Kp // tk),
            in_specs=[pl.BlockSpec((tm, tk), lambda i, j, k: (i, k)),
                      pl.BlockSpec((tk, tn), lambda i, j, k: (k, j)),
                      pl.BlockSpec((1, tn), lambda i, j, k: (0, j)),
                      pl.BlockSpec((tm, tn), lambda i, j, k: (i, j)),
                      pl.BlockSpec((1, tn), lambda i, j, k: (0, j)),
                      pl.BlockSpec((1, tn), lambda i, j, k: (0, j))],
            out_specs=pl.BlockSpec((tm, tn), lambda i, j, k: (i, j))),
        compiler_params=_mosaic_params(("parallel", "parallel", "arbitrary"),
                                       working),
    )(a, w, bias2, res, g2, b2)
    if Mp != M:
        out = out[:M]
    return out


# ==================== JAX glue: box relational embedding ====================
def box_relational_embedding(f_g, dim_g=64, wave_len=1000.0):
    b, o, _ = f_g.shape
    x_min, y_min, x_max, y_max = jnp.split(f_g.astype(jnp.float32), 4, axis=-1)
    cx = (x_min + x_max) * 0.5
    cy = (y_min + y_max) * 0.5
    w = x_max - x_min + 1.0
    h = y_max - y_min + 1.0
    delta_x = jnp.log(jnp.maximum(jnp.abs((cx - jnp.transpose(cx, (0, 2, 1))) / w), 0.001))
    delta_y = jnp.log(jnp.maximum(jnp.abs((cy - jnp.transpose(cy, (0, 2, 1))) / h), 0.001))
    delta_w = jnp.log(w / jnp.transpose(w, (0, 2, 1)))
    delta_h = jnp.log(h / jnp.transpose(h, (0, 2, 1)))
    pos = jnp.stack([delta_x, delta_y, delta_w, delta_h], axis=-1)      # (b,o,o,4)
    feat_range = jnp.arange(dim_g // 8, dtype=jnp.float32)
    dim_mat = 1.0 / (wave_len ** (feat_range / (dim_g / 8)))
    mul = 100.0 * pos[..., None] * dim_mat.reshape(1, 1, 1, 1, -1)
    mul = mul.reshape(b, o, o, -1)
    return jnp.concatenate([jnp.sin(mul), jnp.cos(mul)], axis=-1)       # (b,o,o,dim_g)


# ========================= module forward (h == 1) ==========================
def box_mha_forward(p, input_query, input_key, input_value, input_box, mask=None,
                    *, qkv_shared=True):
    b, o, d_model = input_query.shape
    h = 1                                  # TODO(synk): h > 1 not supported
    d_k = d_model // h
    scale = 1.0 / math.sqrt(float(d_k))
    residual = input_query.astype(jnp.float32)

    # Geometry embedding + WG (64 -> 1) projection: tiny plain-JAX glue, fused by
    # XLA with the trig; relu/clamp/log is fused inside the attention kernel.
    emb = box_relational_embedding(input_box, dim_g=64)                 # (b,o,o,64)
    wg = jnp.einsum("bqkg,g->bqk", emb, p["wg0_w"].reshape(-1)) + p["wg0_b"][0]

    # Fused q/k/v projection: one lane-dense matmul, scale folded into Wq/bq.
    wq = p["lin0_w"].T * scale
    bq = p["lin0_b"] * scale
    if qkv_shared:
        # self-attention (query == key == value), as used by the generator
        w_qkv = jnp.concatenate([wq, p["lin1_w"].T, p["lin2_w"].T], axis=1)   # (d, 3d)
        b_qkv = jnp.concatenate([bq, p["lin1_b"], p["lin2_b"]], axis=0)       # (3d,)
        qkv = pallas_matmul_bias(input_query.reshape(b * o, d_model), w_qkv, b_qkv)
    else:
        # cross-attention fallback: distinct inputs -> three projections
        q2 = pallas_matmul_bias(input_query.reshape(b * o, d_model), wq, bq)
        k2 = pallas_matmul_bias(input_key.reshape(b * o, d_model), p["lin1_w"].T, p["lin1_b"])
        v2 = pallas_matmul_bias(input_value.reshape(b * o, d_model), p["lin2_w"].T, p["lin2_b"])
        qkv = jnp.concatenate([q2, k2, v2], axis=1)
    qkv = qkv.reshape(b, o, 3 * d_k)

    # Box attention + fused residual-add + LayerNorm0.
    out0 = pallas_box_attention_ln(qkv, wg, mask, residual,
                                   p["ln0_g"], p["ln0_b"], d_k=d_k)     # (b,o,d)

    # Output linear + dropout(identity) + fused residual-add + LayerNorm.
    out0_2d = out0.reshape(b * o, d_model)
    out = pallas_linear_add_ln(out0_2d, p["lin3_w"].T, p["lin3_b"],
                               out0_2d, p["ln_g"], p["ln_b"])
    return out.reshape(b, o, d_model)


# ========================= pure-JAX reference ===============================
def reference_forward(p, q_in, k_in, v_in, box, mask):
    b, o, d = q_in.shape
    emb = box_relational_embedding(box, dim_g=64)
    q = (q_in.reshape(-1, d) @ p["lin0_w"].T + p["lin0_b"]).reshape(b, o, d)
    k = (k_in.reshape(-1, d) @ p["lin1_w"].T + p["lin1_b"]).reshape(b, o, d)
    v = (v_in.reshape(-1, d) @ p["lin2_w"].T + p["lin2_b"]).reshape(b, o, d)
    wg = (emb.reshape(-1, 64) @ p["wg0_w"].T + p["wg0_b"]).reshape(b, o, o)
    wg = jnp.maximum(wg, 0.0)
    s = jnp.einsum("bqd,bkd->bqk", q, k) / jnp.sqrt(jnp.float32(d))
    m = jnp.broadcast_to(mask[:, None, :], (b, o, o))
    s = jnp.where(m == 0, -1e9, s)
    s = s + jnp.log(jnp.maximum(wg, 1e-6))
    attn = jax.nn.softmax(s, axis=-1)
    x = jnp.einsum("bqk,bkd->bqd", attn, v)

    def ln(t, g, bb):
        mu = t.mean(-1, keepdims=True)
        var = ((t - mu) ** 2).mean(-1, keepdims=True)
        return (t - mu) / jnp.sqrt(var + 1e-5) * g + bb

    out0 = ln(x + q_in, p["ln0_g"], p["ln0_b"])
    lin3 = (out0.reshape(-1, d) @ p["lin3_w"].T + p["lin3_b"]).reshape(b, o, d)
    return ln(lin3 + out0, p["ln_g"], p["ln_b"])


# =============================== params =====================================
def init_params(key, d_model=128, dim_g=64):
    ks = jax.random.split(key, 10)

    def lin(kw, kb, out_f, in_f):
        w = jax.random.normal(kw, (out_f, in_f), jnp.float32) / np.sqrt(in_f)
        bvec = jax.random.normal(kb, (out_f,), jnp.float32) * 0.01
        return w, bvec

    p = {}
    for i in range(4):
        p[f"lin{i}_w"], p[f"lin{i}_b"] = lin(ks[2 * i], ks[2 * i + 1], d_model, d_model)
    p["wg0_w"], p["wg0_b"] = lin(ks[8], ks[9], 1, dim_g)
    p["ln0_g"] = jnp.ones((d_model,), jnp.float32)
    p["ln0_b"] = jnp.zeros((d_model,), jnp.float32)
    p["ln_g"] = jnp.ones((d_model,), jnp.float32)
    p["ln_b"] = jnp.zeros((d_model,), jnp.float32)
    return p


# ================================ main ======================================
if __name__ == "__main__":
    key = jax.random.PRNGKey(0)
    kp, kx, kb1, kb2 = jax.random.split(key, 4)

    b, o, d_model = 2, 8, 128
    params = init_params(kp, d_model)

    # self-attention usage (query = key = value), as in the LostGAN context encoder
    x = jax.random.normal(kx, (b, o, d_model), jnp.float32)
    xy0 = jax.random.uniform(kb1, (b, o, 2), jnp.float32) * 0.6
    wh = jax.random.uniform(kb2, (b, o, 2), jnp.float32) * 0.3 + 0.05
    box = jnp.concatenate([xy0, xy0 + wh], axis=-1)          # (x_min,y_min,x_max,y_max)
    mask = jnp.ones((b, o), jnp.int32).at[:, -1].set(0)      # last object masked out

    fwd = jax.jit(box_mha_forward)
    out = jax.block_until_ready(fwd(params, x, x, x, box, mask))

    assert out.shape == (b, o, d_model), out.shape
    assert bool(jnp.all(jnp.isfinite(out)))

    ref = reference_forward(params, x, x, x, box, mask)
    np.testing.assert_allclose(np.asarray(out), np.asarray(ref), rtol=0.1, atol=0.1)

    print("KERNEL_OK")
</pallas_src>

<mosaic_0001>
module attributes {stable_mosaic.version = 11 : i64} {
  func.func @_matmul_bias_kernel(%arg0: i32, %arg1: i32, %arg2: i32, %arg3: memref<16x128xbf16, #tpu.memory_space<vmem>>, %arg4: memref<128x384xbf16, #tpu.memory_space<vmem>>, %arg5: memref<1x384xf32, #tpu.memory_space<vmem>>, %arg6: memref<16x384xf32, #tpu.memory_space<vmem>>) attributes {dimension_semantics = [#tpu.dimension_semantics<parallel>, #tpu.dimension_semantics<parallel>, #tpu.dimension_semantics<arbitrary>], iteration_bounds = array<i64: 1, 1, 1>, scalar_prefetch = 0 : i64, scratch_operands = 0 : i64, tpu.core_type = #tpu.core_type<tc>, window_params = [{transform_indices = @transform_0, window_bounds = array<i64: 16, 128>}, {transform_indices = @transform_1, window_bounds = array<i64: 128, 384>}, {transform_indices = @transform_2, window_bounds = array<i64: 1, 384>}, {transform_indices = @transform_3, window_bounds = array<i64: 16, 384>}]} {
    %c0_i32 = arith.constant 0 : i32
    %0 = arith.cmpi eq, %arg2, %c0_i32 : i32
    %1 = arith.extui %0 : i1 to i32
    %c0_i32_0 = arith.constant 0 : i32
    %2 = arith.cmpi ne, %1, %c0_i32_0 : i32
    scf.if %2 {
      %c0_8 = arith.constant 0 : index
      %c0_9 = arith.constant 0 : index
      %9 = vector.load %arg5[%c0_8, %c0_9] : memref<1x384xf32, #tpu.memory_space<vmem>>, vector<1x384xf32>
      %10 = vector.shape_cast %9 : vector<1x384xf32> to vector<1x384xf32>
      %11 = vector.broadcast %10 : vector<1x384xf32> to vector<16x384xf32>
      %c0_10 = arith.constant 0 : index
      %c0_11 = arith.constant 0 : index
      %12 = vector.load %arg6[%c0_10, %c0_11] : memref<16x384xf32, #tpu.memory_space<vmem>>, vector<16x384xf32>
      tpu.vector_store %arg6[%c0_10, %c0_11], %11 {strides = array<i32>} : memref<16x384xf32, #tpu.memory_space<vmem>>, vector<16x384xf32>,
    } else {
    }
    %c0 = arith.constant 0 : index
    %c0_1 = arith.constant 0 : index
    %3 = vector.load %arg6[%c0, %c0_1] : memref<16x384xf32, #tpu.memory_space<vmem>>, vector<16x384xf32>
    %c0_2 = arith.constant 0 : index
    %c0_3 = arith.constant 0 : index
    %4 = vector.load %arg3[%c0_2, %c0_3] : memref<16x128xbf16, #tpu.memory_space<vmem>>, vector<16x128xbf16>
    %c0_4 = arith.constant 0 : index
    %c0_5 = arith.constant 0 : index
    %5 = vector.load %arg4[%c0_4, %c0_5] : memref<128x384xbf16, #tpu.memory_space<vmem>>, vector<128x384xbf16>
    %cst = arith.constant dense<0.000000e+00> : vector<16x384xf32>
    %6 = tpu.matmul %4, %5, %cst {dimension_numbers = #tpu.dot_dimension_numbers<[1], [0], [0], [1], [0, 0, 1, 1], [], []>} : vector<16x128xbf16>, vector<128x384xbf16>, vector<16x384xf32> -> vector<16x384xf32>
    %7 = arith.addf %3, %6 : vector<16x384xf32>
    %c0_6 = arith.constant 0 : index
    %c0_7 = arith.constant 0 : index
    %8 = vector.load %arg6[%c0_6, %c0_7] : memref<16x384xf32, #tpu.memory_space<vmem>>, vector<16x384xf32>
    tpu.vector_store %arg6[%c0_6, %c0_7], %7 {strides = array<i32>} : memref<16x384xf32, #tpu.memory_space<vmem>>, vector<16x384xf32>,
    return
  }
  func.func @transform_0(%arg0: i32, %arg1: i32, %arg2: i32) -> (i32, i32) {
    %c0_i32 = arith.constant 0 : i32
    return %arg0, %arg2 : i32, i32
  }
  func.func @transform_1(%arg0: i32, %arg1: i32, %arg2: i32) -> (i32, i32) {
    %c0_i32 = arith.constant 0 : i32
    return %arg2, %arg1 : i32, i32
  }
  func.func @transform_2(%arg0: i32, %arg1: i32, %arg2: i32) -> (i32, i32) {
    %c0_i32 = arith.constant 0 : i32
    %c0_i32_0 = arith.constant 0 : i32
    return %c0_i32, %arg1 : i32, i32
  }
  func.func @transform_3(%arg0: i32, %arg1: i32, %arg2: i32) -> (i32, i32) {
    %c0_i32 = arith.constant 0 : i32
    return %arg0, %arg1 : i32, i32
  }
}

module attributes {stable_mosaic.version = 11 : i64} {
  func.func @_box_attn_ln_kernel(%arg0: i32, %arg1: memref<1x8x384xbf16, #tpu.memory_space<vmem>>, %arg2: memref<1x8x8xf32, #tpu.memory_space<vmem>>, %arg3: memref<1x1x8xf32, #tpu.memory_space<vmem>>, %arg4: memref<1x8x128xf32, #tpu.memory_space<vmem>>, %arg5: memref<1x128xf32, #tpu.memory_space<vmem>>, %arg6: memref<1x128xf32, #tpu.memory_space<vmem>>, %arg7: memref<1x8x128xf32, #tpu.memory_space<vmem>>) attributes {dimension_semantics = [#tpu.dimension_semantics<parallel>], iteration_bounds = array<i64: 2>, scalar_prefetch = 0 : i64, scratch_operands = 0 : i64, tpu.core_type = #tpu.core_type<tc>, window_params = [{transform_indices = @transform_0, window_bounds = array<i64: 1, 8, 384>}, {transform_indices = @transform_1, window_bounds = array<i64: 1, 8, 8>}, {transform_indices = @transform_2, window_bounds = array<i64: 1, 1, 8>}, {transform_indices = @transform_3, window_bounds = array<i64: 1, 8, 128>}, {pipeline_mode = #tpu.pipeline_mode<synchronous>, transform_indices = @transform_4, window_bounds = array<i64: 1, 128>}, {pipeline_mode = #tpu.pipeline_mode<synchronous>, transform_indices = @transform_5, window_bounds = array<i64: 1, 128>}, {transform_indices = @transform_6, window_bounds = array<i64: 1, 8, 128>}]} {
    %c0 = arith.constant 0 : index
    %c0_0 = arith.constant 0 : index
    %c0_1 = arith.constant 0 : index
    %0 = vector.load %arg1[%c0, %c0_0, %c0_1] : memref<1x8x384xbf16, #tpu.memory_space<vmem>>, vector<1x8x384xbf16>
    %1 = vector.shape_cast %0 : vector<1x8x384xbf16> to vector<8x384xbf16>
    %2 = vector.extract_strided_slice %1 {offsets = [0, 0], sizes = [8, 128], strides = [1, 1]} : vector<8x384xbf16> to vector<8x128xbf16>
    %3 = vector.extract_strided_slice %1 {offsets = [0, 128], sizes = [8, 128], strides = [1, 1]} : vector<8x384xbf16> to vector<8x128xbf16>
    %4 = vector.extract_strided_slice %1 {offsets = [0, 256], sizes = [8, 128], strides = [1, 1]} : vector<8x384xbf16> to vector<8x128xbf16>
    %cst = arith.constant dense<0.000000e+00> : vector<8x8xf32>
    %5 = tpu.matmul %2, %3, %cst {dimension_numbers = #tpu.dot_dimension_numbers<[1], [1], [0], [0], [0, 0, 1, 0], [], []>} : vector<8x128xbf16>, vector<8x128xbf16>, vector<8x8xf32> -> vector<8x8xf32>
    %c0_2 = arith.constant 0 : index
    %c0_3 = arith.constant 0 : index
    %c0_4 = arith.constant 0 : index
    %6 = vector.load %arg3[%c0_2, %c0_3, %c0_4] : memref<1x1x8xf32, #tpu.memory_space<vmem>>, vector<1x1x8xf32>
    %7 = vector.shape_cast %6 : vector<1x1x8xf32> to vector<1x8xf32>
    %cst_5 = arith.constant 0.000000e+00 : f32
    %8 = vector.broadcast %cst_5 : f32 to vector<1x8xf32>
    %9 = arith.cmpf oeq, %7, %8 : vector<1x8xf32>
    %cst_6 = arith.constant -1.000000e+09 : f32
    %10 = vector.shape_cast %9 : vector<1x8xi1> to vector<1x8xi1>
    %11 = vector.broadcast %10 : vector<1x8xi1> to vector<8x8xi1>
    %12 = vector.broadcast %cst_6 : f32 to vector<8x8xf32>
    %13 = arith.select %11, %12, %5 : vector<8x8xi1>, vector<8x8xf32>
    %c0_7 = arith.constant 0 : index
    %c0_8 = arith.constant 0 : index
    %c0_9 = arith.constant 0 : index
    %14 = vector.load %arg2[%c0_7, %c0_8, %c0_9] : memref<1x8x8xf32, #tpu.memory_space<vmem>>, vector<1x8x8xf32>
    %15 = vector.shape_cast %14 : vector<1x8x8xf32> to vector<8x8xf32>
    %cst_10 = arith.constant 9.99999997E-7 : f32
    %16 = vector.broadcast %cst_10 : f32 to vector<8x8xf32>
    %17 = arith.maximumf %15, %16 : vector<8x8xf32>
    %18 = math.log %17 : vector<8x8xf32>
    %19 = arith.addf %13, %18 : vector<8x8xf32>
    %cst_11 = arith.constant dense<0xFF800000> : vector<8xf32>
    %20 = vector.multi_reduction <maximumf>, %19, %cst_11 [1] : vector<8x8xf32> to vector<8xf32>
    %21 = vector.shape_cast %20 : vector<8xf32> to vector<8x1xf32>
    %22 = vector.broadcast %21 : vector<8x1xf32> to vector<8x8xf32>
    %23 = arith.subf %19, %22 : vector<8x8xf32>
    %24 = math.exp %23 : vector<8x8xf32>
    %cst_12 = arith.constant dense<0.000000e+00> : vector<8xf32>
    %25 = vector.multi_reduction <add>, %24, %cst_12 [1] : vector<8x8xf32> to vector<8xf32>
    %26 = vector.shape_cast %25 : vector<8xf32> to vector<8x1xf32>
    %27 = tpu.reciprocal %26 {approx = true} : vector<8x1xf32> -> vector<8x1xf32>
    %28 = vector.broadcast %27 : vector<8x1xf32> to vector<8x8xf32>
    %29 = arith.mulf %24, %28 : vector<8x8xf32>
    %30 = arith.truncf %29 : vector<8x8xf32> to vector<8x8xbf16>
    %cst_13 = arith.constant dense<0.000000e+00> : vector<8x128xf32>
    %31 = tpu.matmul %30, %4, %cst_13 {dimension_numbers = #tpu.dot_dimension_numbers<[1], [0], [0], [1], [0, 0, 1, 1], [], []>} : vector<8x8xbf16>, vector<8x128xbf16>, vector<8x128xf32> -> vector<8x128xf32>
    %c0_14 = arith.constant 0 : index
    %c0_15 = arith.constant 0 : index
    %c0_16 = arith.constant 0 : index
    %32 = vector.load %arg4[%c0_14, %c0_15, %c0_16] : memref<1x8x128xf32, #tpu.memory_space<vmem>>, vector<1x8x128xf32>
    %33 = vector.shape_cast %32 : vector<1x8x128xf32> to vector<8x128xf32>
    %34 = arith.addf %31, %33 : vector<8x128xf32>
    %cst_17 = arith.constant dense<0.000000e+00> : vector<8xf32>
    %35 = vector.multi_reduction <add>, %34, %cst_17 [1] : vector<8x128xf32> to vector<8xf32>
    %36 = vector.shape_cast %35 : vector<8xf32> to vector<8x1xf32>
    %cst_18 = arith.constant 1.280000e+02 : f32
    %37 = vector.broadcast %cst_18 : f32 to vector<8x1xf32>
    %38 = arith.divf %36, %37 : vector<8x1xf32>
    %39 = vector.broadcast %38 : vector<8x1xf32> to vector<8x128xf32>
    %40 = arith.subf %34, %39 : vector<8x128xf32>
    %41 = arith.mulf %40, %40 : vector<8x128xf32>
    %cst_19 = arith.constant dense<0.000000e+00> : vector<8xf32>
    %42 = vector.multi_reduction <add>, %41, %cst_19 [1] : vector<8x128xf32> to vector<8xf32>
    %43 = vector.shape_cast %42 : vector<8xf32> to vector<8x1xf32>
    %cst_20 = arith.constant 1.280000e+02 : f32
    %44 = vector.broadcast %cst_20 : f32 to vector<8x1xf32>
    %45 = arith.divf %43, %44 : vector<8x1xf32>
    %cst_21 = arith.constant 9.99999974E-6 : f32
    %46 = vector.broadcast %cst_21 : f32 to vector<8x1xf32>
    %47 = arith.addf %45, %46 : vector<8x1xf32>
    %48 = math.rsqrt %47 : vector<8x1xf32>
    %49 = vector.broadcast %48 : vector<8x1xf32> to vector<8x128xf32>
    %50 = arith.mulf %40, %49 : vector<8x128xf32>
    %c0_22 = arith.constant 0 : index
    %c0_23 = arith.constant 0 : index
    %51 = vector.load %arg5[%c0_22, %c0_23] : memref<1x128xf32, #tpu.memory_space<vmem>>, vector<1x128xf32>
    %52 = vector.broadcast %51 : vector<1x128xf32> to vector<8x128xf32>
    %53 = arith.mulf %50, %52 : vector<8x128xf32>
    %c0_24 = arith.constant 0 : index
    %c0_25 = arith.constant 0 : index
    %54 = vector.load %arg6[%c0_24, %c0_25] : memref<1x128xf32, #tpu.memory_space<vmem>>, vector<1x128xf32>
    %55 = vector.broadcast %54 : vector<1x128xf32> to vector<8x128xf32>
    %56 = arith.addf %53, %55 : vector<8x128xf32>
    %c0_26 = arith.constant 0 : index
    %c0_27 = arith.constant 0 : index
    %c0_28 = arith.constant 0 : index
    %57 = vector.load %arg7[%c0_26, %c0_27, %c0_28] : memref<1x8x128xf32, #tpu.memory_space<vmem>>, vector<1x8x128xf32>
    %58 = vector.shape_cast %57 : vector<1x8x128xf32> to vector<8x128xf32>
    %59 = vector.shape_cast %56 : vector<8x128xf32> to vector<1x8x128xf32>
    tpu.vector_store %arg7[%c0_26, %c0_27, %c0_28], %59 {strides = array<i32>} : memref<1x8x128xf32, #tpu.memory_space<vmem>>, vector<1x8x128xf32>,
    return
  }
  func.func @transform_0(%arg0: i32) -> (i32, i32, i32) {
    %c0_i32 = arith.constant 0 : i32
    %c0_i32_0 = arith.constant 0 : i32
    %c0_i32_1 = arith.constant 0 : i32
    return %arg0, %c0_i32, %c0_i32_0 : i32, i32, i32
  }
  func.func @transform_1(%arg0: i32) -> (i32, i32, i32) {
    %c0_i32 = arith.constant 0 : i32
    %c0_i32_0 = arith.constant 0 : i32
    %c0_i32_1 = arith.constant 0 : i32
    return %arg0, %c0_i32, %c0_i32_0 : i32, i32, i32
  }
  func.func @transform_2(%arg0: i32) -> (i32, i32, i32) {
    %c0_i32 = arith.constant 0 : i32
    %c0_i32_0 = arith.constant 0 : i32
    %c0_i32_1 = arith.constant 0 : i32
    return %arg0, %c0_i32, %c0_i32_0 : i32, i32, i32
  }
  func.func @transform_3(%arg0: i32) -> (i32, i32, i32) {
    %c0_i32 = arith.constant 0 : i32
    %c0_i32_0 = arith.constant 0 : i32
    %c0_i32_1 = arith.constant 0 : i32
    return %arg0, %c0_i32, %c0_i32_0 : i32, i32, i32
  }
  func.func @transform_4(%arg0: i32) -> (i32, i32) {
    %c0_i32 = arith.constant 0 : i32
    %c0_i32_0 = arith.constant 0 : i32
    %c0_i32_1 = arith.constant 0 : i32
    return %c0_i32, %c0_i32_0 : i32, i32
  }
  func.func @transform_5(%arg0: i32) -> (i32, i32) {
    %c0_i32 = arith.constant 0 : i32
    %c0_i32_0 = arith.constant 0 : i32
    %c0_i32_1 = arith.constant 0 : i32
    return %c0_i32, %c0_i32_0 : i32, i32
  }
  func.func @transform_6(%arg0: i32) -> (i32, i32, i32) {
    %c0_i32 = arith.constant 0 : i32
    %c0_i32_0 = arith.constant 0 : i32
    %c0_i32_1 = arith.constant 0 : i32
    return %arg0, %c0_i32, %c0_i32_0 : i32, i32, i32
  }
}

module attributes {stable_mosaic.version = 11 : i64} {
  func.func @_matmul_bias_add_ln_kernel(%arg0: i32, %arg1: i32, %arg2: i32, %arg3: memref<16x128xbf16, #tpu.memory_space<vmem>>, %arg4: memref<128x128xbf16, #tpu.memory_space<vmem>>, %arg5: memref<1x128xf32, #tpu.memory_space<vmem>>, %arg6: memref<16x128xf32, #tpu.memory_space<vmem>>, %arg7: memref<1x128xf32, #tpu.memory_space<vmem>>, %arg8: memref<1x128xf32, #tpu.memory_space<vmem>>, %arg9: memref<16x128xf32, #tpu.memory_space<vmem>>) attributes {dimension_semantics = [#tpu.dimension_semantics<parallel>, #tpu.dimension_semantics<parallel>, #tpu.dimension_semantics<arbitrary>], iteration_bounds = array<i64: 1, 1, 1>, scalar_prefetch = 0 : i64, scratch_operands = 0 : i64, tpu.core_type = #tpu.core_type<tc>, window_params = [{transform_indices = @transform_0, window_bounds = array<i64: 16, 128>}, {transform_indices = @transform_1, window_bounds = array<i64: 128, 128>}, {transform_indices = @transform_2, window_bounds = array<i64: 1, 128>}, {transform_indices = @transform_3, window_bounds = array<i64: 16, 128>}, {transform_indices = @transform_4, window_bounds = array<i64: 1, 128>}, {transform_indices = @transform_5, window_bounds = array<i64: 1, 128>}, {transform_indices = @transform_6, window_bounds = array<i64: 16, 128>}]} {
    %c0_i32 = arith.constant 0 : i32
    %0 = arith.cmpi eq, %arg2, %c0_i32 : i32
    %1 = arith.extui %0 : i1 to i32
    %c0_i32_0 = arith.constant 0 : i32
    %2 = arith.cmpi ne, %1, %c0_i32_0 : i32
    scf.if %2 {
      %c0_10 = arith.constant 0 : index
      %c0_11 = arith.constant 0 : index
      %12 = vector.load %arg5[%c0_10, %c0_11] : memref<1x128xf32, #tpu.memory_space<vmem>>, vector<1x128xf32>
      %13 = vector.shape_cast %12 : vector<1x128xf32> to vector<1x128xf32>
      %14 = vector.broadcast %13 : vector<1x128xf32> to vector<16x128xf32>
      %c0_12 = arith.constant 0 : index
      %c0_13 = arith.constant 0 : index
      %15 = vector.load %arg9[%c0_12, %c0_13] : memref<16x128xf32, #tpu.memory_space<vmem>>, vector<16x128xf32>
      tpu.vector_store %arg9[%c0_12, %c0_13], %14 {strides = array<i32>} : memref<16x128xf32, #tpu.memory_space<vmem>>, vector<16x128xf32>,
    } else {
    }
    %c0 = arith.constant 0 : index
    %c0_1 = arith.constant 0 : index
    %3 = vector.load %arg9[%c0, %c0_1] : memref<16x128xf32, #tpu.memory_space<vmem>>, vector<16x128xf32>
    %c0_2 = arith.constant 0 : index
    %c0_3 = arith.constant 0 : index
    %4 = vector.load %arg3[%c0_2, %c0_3] : memref<16x128xbf16, #tpu.memory_space<vmem>>, vector<16x128xbf16>
    %c0_4 = arith.constant 0 : index
    %c0_5 = arith.constant 0 : index
    %5 = vector.load %arg4[%c0_4, %c0_5] : memref<128x128xbf16, #tpu.memory_space<vmem>>, vector<128x128xbf16>
    %cst = arith.constant dense<0.000000e+00> : vector<16x128xf32>
    %6 = tpu.matmul %4, %5, %cst {dimension_numbers = #tpu.dot_dimension_numbers<[1], [0], [0], [1], [0, 0, 1, 1], [], []>} : vector<16x128xbf16>, vector<128x128xbf16>, vector<16x128xf32> -> vector<16x128xf32>
    %7 = arith.addf %3, %6 : vector<16x128xf32>
    %c0_6 = arith.constant 0 : index
    %c0_7 = arith.constant 0 : index
    %8 = vector.load %arg9[%c0_6, %c0_7] : memref<16x128xf32, #tpu.memory_space<vmem>>, vector<16x128xf32>
    tpu.vector_store %arg9[%c0_6, %c0_7], %7 {strides = array<i32>} : memref<16x128xf32, #tpu.memory_space<vmem>>, vector<16x128xf32>,
    %c0_i32_8 = arith.constant 0 : i32
    %9 = arith.cmpi eq, %arg2, %c0_i32_8 : i32
    %10 = arith.extui %9 : i1 to i32
    %c0_i32_9 = arith.constant 0 : i32
    %11 = arith.cmpi ne, %10, %c0_i32_9 : i32
    scf.if %11 {
      %c0_10 = arith.constant 0 : index
      %c0_11 = arith.constant 0 : index
      %12 = vector.load %arg9[%c0_10, %c0_11] : memref<16x128xf32, #tpu.memory_space<vmem>>, vector<16x128xf32>
      %c0_12 = arith.constant 0 : index
      %c0_13 = arith.constant 0 : index
      %13 = vector.load %arg6[%c0_12, %c0_13] : memref<16x128xf32, #tpu.memory_space<vmem>>, vector<16x128xf32>
      %14 = arith.addf %12, %13 : vector<16x128xf32>
      %cst_14 = arith.constant dense<0.000000e+00> : vector<16xf32>
      %15 = vector.multi_reduction <add>, %14, %cst_14 [1] : vector<16x128xf32> to vector<16xf32>
      %16 = vector.shape_cast %15 : vector<16xf32> to vector<16x1xf32>
      %cst_15 = arith.constant 1.280000e+02 : f32
      %17 = vector.broadcast %cst_15 : f32 to vector<16x1xf32>
      %18 = arith.divf %16, %17 : vector<16x1xf32>
      %19 = vector.broadcast %18 : vector<16x1xf32> to vector<16x128xf32>
      %20 = arith.subf %14, %19 : vector<16x128xf32>
      %21 = arith.mulf %20, %20 : vector<16x128xf32>
      %cst_16 = arith.constant dense<0.000000e+00> : vector<16xf32>
      %22 = vector.multi_reduction <add>, %21, %cst_16 [1] : vector<16x128xf32> to vector<16xf32>
      %23 = vector.shape_cast %22 : vector<16xf32> to vector<16x1xf32>
      %cst_17 = arith.constant 1.280000e+02 : f32
      %24 = vector.broadcast %cst_17 : f32 to vector<16x1xf32>
      %25 = arith.divf %23, %24 : vector<16x1xf32>
      %cst_18 = arith.constant 9.99999974E-6 : f32
      %26 = vector.broadcast %cst_18 : f32 to vector<16x1xf32>
      %27 = arith.addf %25, %26 : vector<16x1xf32>
      %28 = math.rsqrt %27 : vector<16x1xf32>
      %29 = vector.broadcast %28 : vector<16x1xf32> to vector<16x128xf32>
      %30 = arith.mulf %20, %29 : vector<16x128xf32>
      %c0_19 = arith.constant 0 : index
      %c0_20 = arith.constant 0 : index
      %31 = vector.load %arg7[%c0_19, %c0_20] : memref<1x128xf32, #tpu.memory_space<vmem>>, vector<1x128xf32>
      %32 = vector.broadcast %31 : vector<1x128xf32> to vector<16x128xf32>
      %33 = arith.mulf %30, %32 : vector<16x128xf32>
      %c0_21 = arith.constant 0 : index
      %c0_22 = arith.constant 0 : index
      %34 = vector.load %arg8[%c0_21, %c0_22] : memref<1x128xf32, #tpu.memory_space<vmem>>, vector<1x128xf32>
      %35 = vector.broadcast %34 : vector<1x128xf32> to vector<16x128xf32>
      %36 = arith.addf %33, %35 : vector<16x128xf32>
      %c0_23 = arith.constant 0 : index
      %c0_24 = arith.constant 0 : index
      %37 = vector.load %arg9[%c0_23, %c0_24] : memref<16x128xf32, #tpu.memory_space<vmem>>, vector<16x128xf32>
      tpu.vector_store %arg9[%c0_23, %c0_24], %36 {strides = array<i32>} : memref<16x128xf32, #tpu.memory_space<vmem>>, vector<16x128xf32>,
    } else {
    }
    return
  }
  func.func @transform_0(%arg0: i32, %arg1: i32, %arg2: i32) -> (i32, i32) {
    %c0_i32 = arith.constant 0 : i32
    return %arg0, %arg2 : i32, i32
  }
  func.func @transform_1(%arg0: i32, %arg1: i32, %arg2: i32) -> (i32, i32) {
    %c0_i32 = arith.constant 0 : i32
    return %arg2, %arg1 : i32, i32
  }
  func.func @transform_2(%arg0: i32, %arg1: i32, %arg2: i32) -> (i32, i32) {
    %c0_i32 = arith.constant 0 : i32
    %c0_i32_0 = arith.constant 0 : i32
    return %c0_i32, %arg1 : i32, i32
  }
  func.func @transform_3(%arg0: i32, %arg1: i32, %arg2: i32) -> (i32, i32) {
    %c0_i32 = arith.constant 0 : i32
    return %arg0, %arg1 : i32, i32
  }
  func.func @transform_4(%arg0: i32, %arg1: i32, %arg2: i32) -> (i32, i32) {
    %c0_i32 = arith.constant 0 : i32
    %c0_i32_0 = arith.constant 0 : i32
    return %c0_i32, %arg1 : i32, i32
  }
  func.func @transform_5(%arg0: i32, %arg1: i32, %arg2: i32) -> (i32, i32) {
    %c0_i32 = arith.constant 0 : i32
    %c0_i32_0 = arith.constant 0 : i32
    return %c0_i32, %arg1 : i32, i32
  }
  func.func @transform_6(%arg0: i32, %arg1: i32, %arg2: i32) -> (i32, i32) {
    %c0_i32 = arith.constant 0 : i32
    return %arg0, %arg1 : i32, i32
  }
}

</mosaic_0001>

<bundles_post_ra>
// kernel: box_mha_forward.3
= control target key start
LH: loop header
LB: loop body
LE: loop exit
PB: predicated region body
PF: predicated region fallthrough
CT: control target
= control target key end

     0   :  { %v406_v0 = vmov 0.0   ;;  %vm407_vm0 = vmmov 0   ;;  %v408_v3 = vmov 0   ;;  %v21_v27 = vlaneseq  ;;  %s525_s1 = inlined_call_operand.vmem [shape: bf16[128,384], index: 1, kind: input, shape index: {}]   ;;  %s526_s0 = inlined_call_operand.vmem [shape: bf16[16,128], index: 0, kind: input, shape index: {}]   ;;  %s527_s2 = inlined_call_operand.vmem [shape: f32[1,384], index: 2, kind: input, shape index: {}]   ;;  %s528_s3 = inlined_call_operand.vmem [shape: f32[16,384], index: 3, kind: output, shape index: {}]  }
   0x1   :  { %350 = vmatprep.subr.bf16.mxu1 %v406_v0  ;;  %v373_v1 = vld [vmem:[%s525_s1 + $0xac] ss:$12 sps:$4 sm:$0xff]   ;;  %366 = vmatprep.mubr.msk.bf16.mxu1 %vm407_vm0, %v406_v0  ;;  %v375_v2 = vld [vmem:[%s525_s1 + $0xb0] ss:$12 sps:$4 sm:$0xff]   ;;  %v376_v4 = vld [vmem:[%s525_s1 + $0xa8] ss:$12 sps:$4 sm:$0xff]  }
   0x2   :  { %248 = vmatprep.mubr.bf16.mxu0 %v408_v3  ;;  %216 = vmatprep.subr.bf16.mxu0 %v373_v1  ;;  %v377_v5 = vld [vmem:[%s525_s1 + $0x94] ss:$12 sps:$4 sm:$0xff]   ;;  %v379_v6 = vld [vmem:[%s525_s1 + $0x98] ss:$12 sps:$4 sm:$0xff]   ;;  %v380_v7 = vld [vmem:[%s525_s1 + $0x90] ss:$12 sps:$4 sm:$0xff]  }
   0x3   :  { %351 = vmatpush3.bf16.msra.mxu1 %v375_v2  ;;  %217 = vmatpush1.bf16.msra.mxu0 %v376_v4  ;;  %v381_v8 = vld [vmem:[%s525_s1 + $0x7c] ss:$12 sps:$4 sm:$0xff]   ;;  %v383_v9 = vld [vmem:[%s525_s1 + $0x80] ss:$12 sps:$4 sm:$0xff]   ;;  %v384_v10 = vld [vmem:[%s525_s1 + $0x78] ss:$12 sps:$4 sm:$0xff]  }
   0x4   :  { %352 = vmatprep.subr.bf16.mxu1 %v406_v0  ;;  %218 = vmatprep.subr.bf16.mxu0 %v377_v5  ;;  %v385_v11 = vld [vmem:[%s525_s1 + $0x64] ss:$12 sps:$4 sm:$0xff]   ;;  %v387_v12 = vld [vmem:[%s525_s1 + $0x68] ss:$12 sps:$4 sm:$0xff]   ;;  %v388_v13 = vld [vmem:[%s525_s1 + $0x60] ss:$12 sps:$4 sm:$0xff]  }
   0x5   :  { %v389_v14 = vld [vmem:[%s525_s1 + $0x4c] ss:$12 sps:$4 sm:$0xff]   ;;  %v391_v15 = vld [vmem:[%s525_s1 + $0x50] ss:$12 sps:$4 sm:$0xff]   ;;  %v392_v16 = vld [vmem:[%s525_s1 + $0x48] ss:$12 sps:$4 sm:$0xff]  }
   0x6   :  { %v393_v17 = vld [vmem:[%s525_s1 + $0x34] ss:$12 sps:$4 sm:$0xff]   ;;  %v395_v18 = vld [vmem:[%s525_s1 + $0x38] ss:$12 sps:$4 sm:$0xff]   ;;  %v396_v19 = vld [vmem:[%s525_s1 + $0x30] ss:$12 sps:$4 sm:$0xff]  }
   0x7   :  { %353 = vmatpush3.bf16.msra.mxu1 %v379_v6  ;;  %219 = vmatpush1.bf16.msra.mxu0 %v380_v7  ;;  %v397_v20 = vld [vmem:[%s525_s1 + $0x1c] ss:$12 sps:$4 sm:$0xff]   ;;  %v399_v21 = vld [vmem:[%s525_s1 + $0x20] ss:$12 sps:$4 sm:$0xff]   ;;  %v400_v22 = vld [vmem:[%s525_s1 + $0x18] ss:$12 sps:$4 sm:$0xff]  }
   0x8   :  { %354 = vmatprep.subr.bf16.mxu1 %v406_v0  ;;  %220 = vmatprep.subr.bf16.mxu0 %v381_v8  ;;  %v401_v23 = vld [vmem:[%s525_s1 + $0x4] ss:$12 sps:$4 sm:$0xff]   ;;  %v403_v24 = vld [vmem:[%s525_s1 + $0x8] ss:$12 sps:$4 sm:$0xff]   ;;  %v404_v25 = vld [vmem:[%s525_s1] ss:$12 sps:$4 sm:$0xff]  }
   0x9   :  { %v405_v26 = vld [vmem:[%s526_s0] sm:$0xff]   ;;  %v22_v28 = vshrl.u32 %v21_v27, 7 }
   0xa   :  { %v19_v31 = vld [vmem:[%s527_s2] sm:$0x7] }
   0xb   :  { %355 = vmatpush3.bf16.msra.mxu1 %v383_v9  ;;  %221 = vmatpush1.bf16.msra.mxu0 %v384_v10  ;;  %v31_v29 = vsub.s32 2, %v22_v28  ;;  %v23_v30 = vsub.s32 0, %v22_v28  ;;  %v27_v32 = vsub.s32 1, %v22_v28 }
   0xc   :  { %356 = vmatprep.subr.bf16.mxu1 %v406_v0  ;;  %222 = vmatprep.subr.bf16.mxu0 %v385_v11 }
   0xd   :  { %v32_v33 = vrot.slane %v19_v31, %v31_v29  ;;  %v24_v34 = vrot.slane %v19_v31, %v23_v30  ;;  %v28_v36 = vrot.slane %v19_v31, %v27_v32 }
   0xf   :  { %357 = vmatpush3.bf16.msra.mxu1 %v387_v12  ;;  %223 = vmatpush1.bf16.msra.mxu0 %v388_v13 }
  0x10   :  { %358 = vmatprep.subr.bf16.mxu1 %v406_v0  ;;  %224 = vmatprep.subr.bf16.mxu0 %v389_v14 }
  0x13   :  { %359 = vmatpush3.bf16.msra.mxu1 %v391_v15  ;;  %225 = vmatpush1.bf16.msra.mxu0 %v392_v16 }
  0x14   :  { %360 = vmatprep.subr.bf16.mxu1 %v406_v0  ;;  %226 = vmatprep.subr.bf16.mxu0 %v393_v17 }
  0x17   :  { %361 = vmatpush3.bf16.msra.mxu1 %v395_v18  ;;  %227 = vmatpush1.bf16.msra.mxu0 %v396_v19 }
  0x18   :  { %362 = vmatprep.subr.bf16.mxu1 %v406_v0  ;;  %228 = vmatprep.subr.bf16.mxu0 %v397_v20 }
  0x1b   :  { %363 = vmatpush3.bf16.msra.mxu1 %v399_v21  ;;  %229 = vmatpush1.bf16.msra.mxu0 %v400_v22 }
  0x1c   :  { %364 = vmatprep.subr.bf16.mxu1 %v406_v0  ;;  %230 = vmatprep.subr.bf16.mxu0 %v401_v23 }
  0x1f   :  { %365 = vmatpush3.bf16.msra.mxu1 %v403_v24  ;;  %231 = vmatpush1.bf16.msra.mxu0 %v404_v25 }
  0x22   :  { %367 = vmatmul.mubr.bf16.vlgmr.msra.gmra.mxu1 %v405_v26  ;;  %249 = vmatmul.mubr.bf16.vlgmr.msra.gmra.mxu0 %v405_v26 }
  0xe2   :  { %v293_v35 = vpop.f32.mrf.mxu1  ;;  %v250_v38 = vpop.f32.mrf.mxu0 }
  0xe3   :  { %v302_v37 = vadd.f32 %v293_v35, %v32_v33  ;;  %v300_v39 = vadd.f32 %v250_v38, %v24_v34 }
  0xe4   :  { %v368_v40 = vpop.f32.mrf.mxu1  ;;  %v252_v41 = vpop.f32.mrf.mxu0 }
  0xe5   :  { %308 = vst [vmem:[%s528_s3 + $0x10] sm:$0xff] %v302_v37  ;;  %306 = vst [vmem:[%s528_s3] sm:$0xff] %v300_v39  ;;  %v301_v42 = vadd.f32 %v252_v41, %v28_v36 }
  0xe6   :  { %v296_v43 = vpop.f32.mrf.mxu1  ;;  %v254_v45 = vpop.f32.mrf.mxu0 }
  0xe7   :  { %v305_v44 = vadd.f32 %v296_v43, %v32_v33  ;;  %307 = vst [vmem:[%s528_s3 + $0x8] sm:$0xff] %v301_v42  ;;  %v303_v46 = vadd.f32 %v254_v45, %v24_v34 }
  0xe8   :  { %v369_v47 = vpop.f32.mrf.mxu1  ;;  %v256_v48 = vpop.f32.mrf.mxu0 }
  0xe9   :  { %311 = vst [vmem:[%s528_s3 + $0x28] sm:$0xff] %v305_v44  ;;  %309 = vst [vmem:[%s528_s3 + $0x18] sm:$0xff] %v303_v46  ;;  %v304_v49 = vadd.f32 %v256_v48, %v28_v36 }
  0xeb   :  { %310 = vst [vmem:[%s528_s3 + $0x20] sm:$0xff] %v304_v49 }

// kernel: box_mha_forward.4
= control target key start
LH: loop header
LB: loop body
LE: loop exit
PB: predicated region body
PF: predicated region fallthrough
CT: control target
= control target key end

     0   :  { %s633_s21 = smov 0   ;;  %s677_s0 = inlined_call_operand.vmem [shape: bf16[2,8,384], index: 0, kind: input, shape index: {}]   ;;  %s678_s1 = inlined_call_operand.vmem [shape: f32[2,8,8], index: 1, kind: input, shape index: {}]   ;;  %s679_s2 = inlined_call_operand.vmem [shape: f32[2,1,8], index: 2, kind: input, shape index: {}]   ;;  %s680_s3 = inlined_call_operand.vmem [shape: f32[2,8,128], index: 3, kind: input, shape index: {}]   ;;  %s681_s4 = inlined_call_operand.vmem [shape: f32[1,128], index: 4, kind: input, shape index: {}]   ;;  %s682_s5 = inlined_call_operand.vmem [shape: f32[1,128], index: 5, kind: input, shape index: {}]   ;;  %s683_s6 = inlined_call_operand.vmem [shape: f32[2,8,128], index: 6, kind: output, shape index: {}]  }
   0x1 LB: > { %s535_s22 = sadd.s32 4294967295, %s593_s21   ;;  %p539_p0 = scmp.ge.s32.totalorder %s593_s21, 1  ;;  %s593_s21 = sphi %s633_s21, %s16_s21  }
   0x2   : > { %p238_p1 = scmp.lt.s32.totalorder %s593_s21, 3 }
   0x4   : > { %p239_p2 = pnand %p539_p0, %p238_p1 }
   0x5   : > { %p278_p3 = scmp.lt.s32.totalorder (!%p239_p2), %s535_s22, 1 }
   0x6   : > { %242 = sbr.rel (%p239_p2) target bundleno = 1037 (0x40d), region = 44 }
   0xb   : > { %v595_v0 = vmov 0.0   ;;  %vm596_vm0 = vmmov 0   ;;  %s685_s22 = smov (!%p278_p3, %s535_s22), 1  ;;  %v348_v5 = vlaneseq  ;;  %v597_v9 = vmov 0   ;;  %v546_v46 = vld [vmem:[%s681_s4] ss:$0 sm:$0xff] }
   0xc   : > { %554 = vmatprep.subr.bf16.mxu0 %v595_v0  ;;  %556 = vmatprep.mubr.msk.bf16.mxu0 %vm596_vm0, %v595_v0  ;;  %s566_s23 = smul.u32 12, %s685_s22  ;;  %s647_s27 = sshll.u32 %s685_s22, 3  ;;  %vm359_vm3 = vcmask 64512   ;;  %vm376_vm4 = vcmask 1043456   ;;  %v547_v48 = vld [vmem:[%s682_s5] ss:$0 sm:$0xff] }
   0xd   : > { %560 = vmatprep.subr.bf16.mxu1 %v595_v0  ;;  %562 = vmatprep.mubr.msk.bf16.mxu1 %vm596_vm0, %v595_v0  ;;  %s286_s30 = scalar_lea.vmem %s678_s1, %s647_s27  ;;  %s289_s9 = scalar_lea.vmem %s679_s2, %s685_s22  ;;  %v349_v7 = vshrl.u32 %v348_v5, 7 }
   0xe   : > { %s644_s26 = scalar_lea.vmem %s677_s0, %s566_s23  ;;  %v354_v3 = vld [vmem:[%s286_s30] sm:$0xff]  ;;  %s293_s12 = scalar_lea.vmem %s680_s3, %s647_s27 }
   0xf   : > { %v299_v1 = vld [vmem:[%s644_s26] sm:$0xff]  ;;  %v355_v4 = vmax.f32 %v354_v3, 1e-06  ;;  %v350_v8 = vsub.s32 0, %v349_v7  ;;  %v300_v26 = vld [vmem:[%s644_s26 + $0x8] sm:$0xf]  ;;  %s297_s19 = scalar_lea.vmem %s683_s6, %s647_s27 }
  0x10   : > { %v544_v2 = vcombine.high %v299_v1, %v299_v1  ;;  %v345_v6 = vld [vmem:[%s289_s9] sm:$0x1]  ;;  %v378_v27 = vsel %vm376_vm4, %v300_v26, 0 }
  0x11   : > { %579 = vlog2.f32 %v355_v4  ;;  %vm346_vm1 = vcmp.eq.f32.partialorder %v345_v6, 0.0  ;;  %561 = vmatpush3.bf16.msra.mxu1 %v378_v27  ;;  %v372_v32 = vld [vmem:[%s293_s12] sm:$0xff] }
  0x12   : > { %555 = vmatpush3.bf16.xpose.msra.mxu0 %v544_v2  ;;  %v347_v10 = vsel %vm346_vm1, 1, %v597_v9 }
  0x13   : > { %v351_v11 = vrot.slane %v347_v10, %v350_v8 }
  0x15   : > { %vm352_vm2 = vcmp.eq.s32.totalorder %v351_v11, 1 }
  0x19   : > { %557 = vmatmul.mubr.bf16.vlgmr.msra.gmra.mxu0 %v299_v1 }
  0x1e   : > { %v580_v12 = vpop.eup %579 }
  0x1f   : > { %v357_v13 = vmul.f32 0.6931472, %v580_v12 }
  0xd9   : > { %v339_v14 = vpop.f32.mrf.mxu0 }
  0xda   : > { %v353_v15 = vsel %vm352_vm2, -1e+09, %v339_v14 }
  0xdb   : > { %v358_v16 = vadd.f32 %v357_v13, %v353_v15  ;;  %v558_v17 = vpop.f32.mrf.mxu0 }
  0xdd   : > { %v342_v18 = vpop.f32.mrf.mxu0  ;;  %v360_v19 = vsel %vm359_vm3, %v358_v16, -inf }
  0xde   : > { %361 = vmax.xlane.f32.xlu0 %v360_v19 }
  0xdf   : > { %v559_v20 = vpop.f32.mrf.mxu0 }
 0x167   : > { %v362_v21 = vpop.xlane.xlu0 %361 }
 0x168   : > { %v363_v22 = vsub.f32 %v358_v16, %v362_v21 }
 0x16a   : > { %v364_v23 = vmul.f32 1.442695, %v363_v22 }
 0x16c   : > { %581 = vpow2.f32 %v364_v23 }
 0x179   : > { %v582_v24 = vpop.eup %581 }
 0x17a   : > { %v366_v25 = vsel %vm359_vm3, %v582_v24, 0.0 }
 0x17b   : > { %367 = vadd.xlane.f32.xlu0 %v366_v25 }
 0x204   : > { %v368_v28 = vpop.xlane.xlu0 %367 }
 0x205   : > { %583 = vrcp.f32 %v368_v28 }
 0x212   : > { %v584_v29 = vpop.eup %583 }
 0x213   : > { %v370_v30 = vmul.f32 %v584_v29, %v582_v24 }
 0x215   : > { %v371_v31 = vpack.c.bf16 %v370_v30, %v370_v30 }
 0x217   : > { %563 = vmatmul.mubr.msk.bf16.vlgmr.msra.gmra.mxu1 %vm359_vm3, %v371_v31 }
 0x2d7   : > { %v414_v33 = vpop.f32.mrf.mxu1 }
 0x2d8   : > { %v415_v34 = vadd.f32 %v414_v33, %v372_v32 }
 0x2d9   : > { %v564_v35 = vpop.f32.mrf.mxu1 }
 0x2da   : > { %420 = vadd.xlane.f32.xlu1 %v415_v34 }
 0x2db   : > { %v417_v36 = vpop.f32.mrf.mxu1 }
 0x2dd   : > { %v565_v37 = vpop.f32.mrf.mxu1 }
 0x363   : > { %v421_v38 = vpop.xlane.xlu1 %420 }
 0x364   : > { %v423_v39 = vmul.f32 0.0078125, %v421_v38 }
 0x366   : > { %v424_v40 = vsub.f32 %v415_v34, %v423_v39 }
 0x368   : > { %v425_v41 = vmul.f32 %v424_v40, %v424_v40 }
 0x36a   : > { %426 = vadd.xlane.f32.xlu1 %v425_v41 }
 0x3f3   : > { %v427_v42 = vpop.xlane.xlu1 %426 }
 0x3f4   : > { %v428_v43 = vmul.f32 0.0078125, %v427_v42 }
 0x3f6   : > { %v429_v44 = vadd.f32 1e-05, %v428_v43 }
 0x3f8   : > { %585 = vrsqrt.f32 %v429_v44 }
 0x405   : > { %v586_v45 = vpop.eup %585 }
 0x406   : > { %v431_v47 = vmul.f32 %v586_v45, %v424_v40 }
 0x408   : > { %v439_v49 = vmul.f32 %v546_v46, %v431_v47 }
 0x40a   : > { %v447_v50 = vadd.f32 %v547_v48, %v439_v49 }
 0x40c   : > { %448 = vst [vmem:[%s297_s19] sm:$0xff] %v447_v50 }
 0x40d PF: > { %s16_s21 = sadd.s32 1, %s593_s21  }
 0x40e   : > { %p13_p4 = scmp.ge.s32.totalorder %s16_s21, 4  }
 0x410   :  { %15 = sbr.rel (!%p13_p4) target bundleno = 1 (0x1), region = 83 }

// kernel: box_mha_forward.5
= control target key start
LH: loop header
LB: loop body
LE: loop exit
PB: predicated region body
PF: predicated region fallthrough
CT: control target
= control target key end

     0   :  { %v306_v1 = vmov 0.0   ;;  %vm307_vm0 = vmmov 0   ;;  %s391_s0 = inlined_call_operand.vmem [shape: bf16[16,128], index: 0, kind: input, shape index: {}]   ;;  %s392_s1 = inlined_call_operand.vmem [shape: bf16[128,128], index: 1, kind: input, shape index: {}]   ;;  %s393_s2 = inlined_call_operand.vmem [shape: f32[1,128], index: 2, kind: input, shape index: {}]   ;;  %s394_s3 = inlined_call_operand.vmem [shape: f32[16,128], index: 3, kind: input, shape index: {}]   ;;  %s395_s4 = inlined_call_operand.vmem [shape: f32[1,128], index: 4, kind: input, shape index: {}]   ;;  %s396_s5 = inlined_call_operand.vmem [shape: f32[1,128], index: 5, kind: input, shape index: {}]   ;;  %s397_s6 = inlined_call_operand.hbm [shape: f32[16,128], index: 6, kind: output, shape index: {}]  }
   0x1   :  { %v271_v0 = vld [vmem:[%s392_s1 + $0x38] sm:$0xff]   ;;  %246 = vmatprep.subr.bf16.mxu0 %v306_v1  ;;  %v272_v2 = vld [vmem:[%s392_s1 + $0x30] sm:$0xff]   ;;  %262 = vmatprep.mubr.msk.bf16.mxu0 %vm307_vm0, %v306_v1  ;;  %v273_v3 = vld [vmem:[%s392_s1 + $0x28] sm:$0xff]  }
   0x2   :  { %247 = vmatpush3.bf16.msra.mxu0 %v271_v0 }
   0x3   :  { %248 = vmatprep.subr.bf16.mxu0 %v306_v1 }
   0x6   :  { %249 = vmatpush3.bf16.msra.mxu0 %v272_v2 }
   0x7   :  { %250 = vmatprep.subr.bf16.mxu0 %v306_v1 }
   0x8   :  { %11 = vsyncpa [#allocation3], 0  ;;  %v274_v4 = vld [vmem:[%s392_s1 + $0x20] sm:$0xff]   ;;  %v275_v5 = vld [vmem:[%s392_s1 + $0x18] sm:$0xff]   ;;  %s308_s21 = smov [#allocation2]  }
   0x9   :  { %v276_v6 = vld [vmem:[%s392_s1 + $0x10] sm:$0xff]   ;;  %v277_v7 = vld [vmem:[%s392_s1 + $0x8] sm:$0xff]   ;;  %v278_v8 = vld [vmem:[%s392_s1] sm:$0xff]   ;;  %s214_s22 = sshll.u32 %s308_s21, 4  ;;  %s215_s22 = int_to_ptr.vmem [resolvable:$true] %s214_s22 }
   0xa   :  { %251 = vmatpush3.bf16.msra.mxu0 %v273_v3  ;;  %v279_v9 = vld [vmem:[%s391_s0] sm:$0xff]   ;;  %v163_v17 = vld [vmem:[%s394_s3 + $0x8] sm:$0xff]  ;;  %s284_s23 = scalar_lea.vmem %s215_s22, 256  ;;  %p289_p1 = scmp.lt.s32.totalorder %s215_s22, %s215_s22 }
   0xb   :  { %252 = vmatprep.subr.bf16.mxu0 %v306_v1  ;;  %v225_v10 = vld [vmem:[%s393_s2] ss:$0 sm:$0xff]  ;;  %p285_p0 = scmp.ne.s32.totalorder %s215_s22, %s284_s23  ;;  %p290_p2 = scmp.lt.s32.totalorder %s284_s23, %s284_s23 }
   0xc   :  { %v162_v12 = vld [vmem:[%s394_s3] sm:$0xff] }
   0xd   :  { %v235_v36 = vld [vmem:[%s395_s4] ss:$0 sm:$0xff]  ;;  %p291_p3 = por %p290_p2, %p289_p1 }
   0xe   :  { %253 = vmatpush3.bf16.msra.mxu0 %v274_v4  ;;  %v236_v38 = vld [vmem:[%s396_s5] ss:$0 sm:$0xff] }
   0xf   :  { %254 = vmatprep.subr.bf16.mxu0 %v306_v1  ;;  %p292_p4 = pnand %p291_p3, %p285_p0 }
  0x12   :  { %255 = vmatpush3.bf16.msra.mxu0 %v275_v5 }
  0x13   :  { %256 = vmatprep.subr.bf16.mxu0 %v306_v1 }
  0x16   :  { %257 = vmatpush3.bf16.msra.mxu0 %v276_v6 }
  0x17   :  { %258 = vmatprep.subr.bf16.mxu0 %v306_v1 }
  0x1a   :  { %259 = vmatpush3.bf16.msra.mxu0 %v277_v7 }
  0x1b   :  { %260 = vmatprep.subr.bf16.mxu0 %v306_v1 }
  0x1e   :  { %261 = vmatpush3.bf16.msra.mxu0 %v278_v8 }
  0x21   :  { %263 = vmatmul.mubr.bf16.vlgmr.msra.gmra.mxu0 %v279_v9 }
  0xe1   :  { %v146_v11 = vpop.f32.mrf.mxu0 }
  0xe2   :  { %v153_v13 = vadd.f32 %v225_v10, %v146_v11 }
  0xe3   :  { %v264_v14 = vpop.f32.mrf.mxu0 }
  0xe4   :  { %v164_v15 = vadd.f32 %v162_v12, %v153_v13 }
  0xe5   :  { %v149_v16 = vpop.f32.mrf.mxu0 }
  0xe6   :  { %v154_v18 = vadd.f32 %v225_v10, %v149_v16  ;;  %166 = vadd.xlane.f32.xlu0 %v164_v15 }
  0xe7   :  { %v265_v19 = vpop.f32.mrf.mxu0 }
  0xe8   :  { %v165_v20 = vadd.f32 %v163_v17, %v154_v18 }
  0xea   :  { %168 = vadd.xlane.f32.xlu0 %v165_v20 }
 0x16f   :  { %v167_v21 = vpop.xlane.xlu0 %166 }
 0x170   :  { %v171_v22 = vmul.f32 0.0078125, %v167_v21 }
 0x172   :  { %v173_v23 = vsub.f32 %v164_v15, %v171_v22 }
 0x173   :  { %v169_v24 = vpop.xlane.xlu0 %168 }
 0x174   :  { %v172_v25 = vmul.f32 0.0078125, %v169_v24  ;;  %v175_v26 = vmul.f32 %v173_v23, %v173_v23 }
 0x176   :  { %v174_v27 = vsub.f32 %v165_v20, %v172_v25  ;;  %177 = vadd.xlane.f32.xlu1 %v175_v26 }
 0x178   :  { %v176_v28 = vmul.f32 %v174_v27, %v174_v27 }
 0x17a   :  { %179 = vadd.xlane.f32.xlu1 %v176_v28 }
 0x1ff   :  { %v178_v29 = vpop.xlane.xlu1 %177 }
 0x200   :  { %v181_v30 = vmul.f32 0.0078125, %v178_v29 }
 0x202   :  { %v183_v31 = vadd.f32 1e-05, %v181_v30 }
 0x203   :  { %v180_v32 = vpop.xlane.xlu1 %179 }
 0x204   :  { %280 = vrsqrt.f32 %v183_v31  ;;  %v182_v33 = vmul.f32 0.0078125, %v180_v32 }
 0x206   :  { %v184_v34 = vadd.f32 1e-05, %v182_v33 }
 0x208   :  { %282 = vrsqrt.f32 %v184_v34 }
 0x211   :  { %v281_v35 = vpop.eup %280 }
 0x212   :  { %v187_v37 = vmul.f32 %v281_v35, %v173_v23 }
 0x214   :  { %v196_v39 = vmul.f32 %v235_v36, %v187_v37 }
 0x215   :  { %v283_v40 = vpop.eup %282 }
 0x216   :  { %v188_v41 = vmul.f32 %v283_v40, %v174_v27  ;;  %v205_v42 = vadd.f32 %v236_v38, %v196_v39 }
 0x218   :  { %v197_v43 = vmul.f32 %v235_v36, %v188_v41  ;;  %207 = vst [vmem:[#allocation2] sm:$0xff] %v205_v42 }
 0x21a   :  { %v206_v44 = vadd.f32 %v236_v38, %v197_v43 }
 0x21c   :  { %208 = vst [vmem:[#allocation2 + $0x8] sm:$0xff] %v206_v44 }
 0x21d   :  { %295 = shalt.err (!%p292_p4)
}
 0x21e   :  { %s309_s4 = smov 128   ;;  %s310_s5 = smov 8  }
 0x21f   :  { %220 = dma.vmem_to_hbm [thread:$0]  %s215_s22, 256, %s397_s6, [#allocation3], %s309_s4, %s309_s4, %s310_s5  }
 0x220   :  { %304 = dma.done.wait [#allocation3], 256  }
 0x221   :  { %305 = vsyncadd [#allocation3], 4294967040 }
 0x222   :  { %224 = vsyncpa [#allocation3], 1 }

</bundles_post_ra>
